<compile_context>
chip_gen: v5e
topology: v5e:2x2
jax: 0.10.0
libtpu: 0.0.40
codegen_flags: <defaults>
</compile_context>

<pallas_src>
import math

import jax
import jax.numpy as jnp
from jax.experimental import pallas as pl
from jax.experimental.pallas import tpu as pltpu

LN_EPS = 1e-5
# Matmul operand dtype (accumulation is always f32).  Set to jnp.float32 for
# bit-closer parity with the f32 PyTorch reference.
MATMUL_DTYPE = jnp.bfloat16


def _layer_norm(v, gamma, beta):
    """PyTorch nn.LayerNorm over the last dim (biased variance, eps=1e-5), f32."""
    mu = jnp.mean(v, axis=-1, keepdims=True)
    var = jnp.mean(jnp.square(v - mu), axis=-1, keepdims=True)
    return (v - mu) * jax.lax.rsqrt(var + LN_EPS) * gamma + beta


def encoder_stack_kernel(x_ref, wq_ref, wk_ref, wv_ref, wo_ref, bo_ref,
                         g1_ref, be1_ref, g2_ref, be2_ref,
                         wf1_ref, bf1_ref, wf2_ref, bf2_ref,
                         gF_ref, bF_ref, o_ref):
    """One grid step = (one batch tile, one encoder layer).

    x_ref:   (1, S, D) input block (only read at layer 0).
    o_ref:   (1, S, D) output block — resident in VMEM across the layer axis and
             used as the activation accumulator.
    w*_ref:  per-layer weight blocks (leading stacked-layer dim squeezed to 1),
             already transposed to (in, out) and cast to MATMUL_DTYPE host-side.
    """
    l = pl.program_id(1)
    n_layers = pl.num_programs(1)

    # Seed the resident activation at the first layer of each batch tile.
    @pl.when(l == 0)
    def _():
        o_ref[0] = x_ref[0]

    x = o_ref[0]                                                      # (S, D) f32

    # ---- pre-norm + single-head self attention (no masks / bias, dropout=0) ----
    h = _layer_norm(x, g1_ref[0], be1_ref[0]).astype(MATMUL_DTYPE)    # (S, D)
    q = jnp.dot(h, wq_ref[0], preferred_element_type=jnp.float32)     # scale folded in
    k = jnp.dot(h, wk_ref[0], preferred_element_type=jnp.float32)
    v = jnp.dot(h, wv_ref[0], preferred_element_type=jnp.float32)

    # q @ k^T without an in-kernel transpose: contract the last dim of both operands.
    scores = jax.lax.dot_general(
        q.astype(MATMUL_DTYPE), k.astype(MATMUL_DTYPE),
        dimension_numbers=(((1,), (1,)), ((), ())),
        preferred_element_type=jnp.float32)                           # (S, S) f32

    m = jnp.max(scores, axis=-1, keepdims=True)
    p = jnp.exp(scores - m)
    attn = p * pl.reciprocal(jnp.sum(p, axis=-1, keepdims=True), approx=True)

    a = jnp.dot(attn.astype(MATMUL_DTYPE), v.astype(MATMUL_DTYPE),
                preferred_element_type=jnp.float32)                   # (S, D)
    a = jnp.dot(a.astype(MATMUL_DTYPE), wo_ref[0],
                preferred_element_type=jnp.float32) + bo_ref[0]
    x = x + a                                                         # residual

    # ---- pre-norm + feed forward ----
    # TODO(synk): DenseNetwork source not provided; using a 2-layer MLP
    #             (Linear -> LeakyReLU(0.1) -> Linear), the library's default style.
    h2 = _layer_norm(x, g2_ref[0], be2_ref[0]).astype(MATMUL_DTYPE)
    f = jnp.dot(h2, wf1_ref[0], preferred_element_type=jnp.float32) + bf1_ref[0]
    f = jnp.where(f > 0, f, 0.1 * f)
    f = jnp.dot(f.astype(MATMUL_DTYPE), wf2_ref[0],
                preferred_element_type=jnp.float32) + bf2_ref[0]
    x = x + f                                                         # residual

    o_ref[0] = x

    # Final LayerNorm fused into the last layer step (no separate pallas_call).
    @pl.when(l == n_layers - 1)
    def _():
        o_ref[0] = _layer_norm(x, gF_ref[...], bF_ref[...])


def _prepare_stacked_params(layer_params, final_params):
    """One-time host-side prep: split fused QKV, transpose to (in, out), fold the
    1/sqrt(head_dim) scale into W_q, cast matmul weights to MATMUL_DTYPE, and stack
    everything along a leading layer axis."""
    d = layer_params[0]["w_all"].shape[1]
    scale = 1.0 / math.sqrt(d)                       # head_dim == model_dim (num_heads=1)

    def stack(fn):
        return jnp.stack([fn(p) for p in layer_params], axis=0)

    return dict(
        wq=stack(lambda p: (p["w_all"][:d].T * scale).astype(MATMUL_DTYPE)),   # (L, D, D)
        wk=stack(lambda p: p["w_all"][d:2 * d].T.astype(MATMUL_DTYPE)),
        wv=stack(lambda p: p["w_all"][2 * d:].T.astype(MATMUL_DTYPE)),
        wo=stack(lambda p: p["w_out"].T.astype(MATMUL_DTYPE)),
        bo=stack(lambda p: p["b_out"].reshape(1, -1)),                         # (L, 1, D) f32
        g1=stack(lambda p: p["g1"].reshape(1, -1)),
        be1=stack(lambda p: p["be1"].reshape(1, -1)),
        g2=stack(lambda p: p["g2"].reshape(1, -1)),
        be2=stack(lambda p: p["be2"].reshape(1, -1)),
        wf1=stack(lambda p: p["w_ff1"].T.astype(MATMUL_DTYPE)),                # (L, D, H)
        bf1=stack(lambda p: p["b_ff1"].reshape(1, -1)),                        # (L, 1, H)
        wf2=stack(lambda p: p["w_ff2"].T.astype(MATMUL_DTYPE)),                # (L, H, D)
        bf2=stack(lambda p: p["b_ff2"].reshape(1, -1)),                        # (L, 1, D)
        gF=final_params["g"].reshape(1, -1),                                   # (1, D)
        bF=final_params["b"].reshape(1, -1),
    )


def _layer_spec(arr):
    """Per-layer block of a layer-stacked 3-D array, indexed by the layer grid axis."""
    return pl.BlockSpec((1,) + arr.shape[1:], lambda b, l: (l, 0, 0))


def transformer_encoder(x, layer_params, final_params):
    """Stack of encoder layers + final LayerNorm (TransformerEncoder.forward),
    fused into a single pallas_call."""
    B, S, D = x.shape
    sp = _prepare_stacked_params(layer_params, final_params)
    num_layers = sp["wq"].shape[0]

    stacked = [sp[k] for k in ("wq", "wk", "wv", "wo", "bo",
                               "g1", "be1", "g2", "be2",
                               "wf1", "bf1", "wf2", "bf2")]

    in_specs = (
        [pl.BlockSpec((1, S, D), lambda b, l: (b, 0, 0))]            # x (read at l == 0)
        + [_layer_spec(w) for w in stacked]
        + [pl.BlockSpec(sp["gF"].shape, lambda b, l: (0, 0)),        # final LN params
           pl.BlockSpec(sp["bF"].shape, lambda b, l: (0, 0))]
    )

    return pl.pallas_call(
        encoder_stack_kernel,
        out_shape=jax.ShapeDtypeStruct((B, S, D), jnp.float32),
        grid=(B, num_layers),
        in_specs=in_specs,
        # Block index is constant along the layer axis -> activation stays resident
        # in VMEM for the whole stack; HBM writeback happens once per batch tile.
        out_specs=pl.BlockSpec((1, S, D), lambda b, l: (b, 0, 0)),
        compiler_params=pltpu.CompilerParams(
            dimension_semantics=("parallel", "arbitrary")),
    )(x, *stacked, sp["gF"], sp["bF"])


def init_params(key, num_layers, model_dim, ff_hidden):
    """Deterministic synthetic parameters with nn.Linear-style uniform init
    (kept in PyTorch W[out, in] layout; the wrapper does the one-time repack)."""
    def uni(k, shape, fan_in):
        s = 1.0 / math.sqrt(fan_in)
        return jax.random.uniform(k, shape, jnp.float32, -s, s)

    layers = []
    for _ in range(num_layers):
        key, *ks = jax.random.split(key, 8)
        layers.append(dict(
            w_all=uni(ks[0], (3 * model_dim, model_dim), model_dim),   # all_linear (no bias)
            w_out=uni(ks[1], (model_dim, model_dim), model_dim),       # out_linear
            b_out=uni(ks[2], (1, model_dim), model_dim),
            g1=jnp.ones((1, model_dim), jnp.float32),                  # norm1
            be1=jnp.zeros((1, model_dim), jnp.float32),
            g2=jnp.ones((1, model_dim), jnp.float32),                  # norm2
            be2=jnp.zeros((1, model_dim), jnp.float32),
            w_ff1=uni(ks[3], (ff_hidden, model_dim), model_dim),       # dense net
            b_ff1=uni(ks[4], (1, ff_hidden), model_dim),
            w_ff2=uni(ks[5], (model_dim, ff_hidden), ff_hidden),
            b_ff2=uni(ks[6], (1, model_dim), ff_hidden),
        ))
    final = dict(g=jnp.ones((1, model_dim), jnp.float32),
                 b=jnp.zeros((1, model_dim), jnp.float32))
    return layers, final


if __name__ == "__main__":
    MODEL_DIM = 32
    NUM_LAYERS = 3
    FF_HIDDEN = 2 * MODEL_DIM
    BATCH, SEQ = 2, 8

    key = jax.random.PRNGKey(0)
    key, kx = jax.random.split(key)
    x = jax.random.normal(kx, (BATCH, SEQ, MODEL_DIM), jnp.float32)

    layer_params, final_params = init_params(key, NUM_LAYERS, MODEL_DIM, FF_HIDDEN)

    encoder = jax.jit(transformer_encoder)
    out = encoder(x, layer_params, final_params)
    out = jax.block_until_ready(out)
    assert out.shape == (BATCH, SEQ, MODEL_DIM)
    assert bool(jnp.all(jnp.isfinite(out)))
    print("KERNEL_OK")
</pallas_src>

<mosaic_0001>
module attributes {stable_mosaic.version = 11 : i64} {
  func.func @encoder_stack_kernel(%arg0: i32, %arg1: i32, %arg2: memref<1x8x32xf32, #tpu.memory_space<vmem>>, %arg3: memref<1x32x32xbf16, #tpu.memory_space<vmem>>, %arg4: memref<1x32x32xbf16, #tpu.memory_space<vmem>>, %arg5: memref<1x32x32xbf16, #tpu.memory_space<vmem>>, %arg6: memref<1x32x32xbf16, #tpu.memory_space<vmem>>, %arg7: memref<1x1x32xf32, #tpu.memory_space<vmem>>, %arg8: memref<1x1x32xf32, #tpu.memory_space<vmem>>, %arg9: memref<1x1x32xf32, #tpu.memory_space<vmem>>, %arg10: memref<1x1x32xf32, #tpu.memory_space<vmem>>, %arg11: memref<1x1x32xf32, #tpu.memory_space<vmem>>, %arg12: memref<1x32x64xbf16, #tpu.memory_space<vmem>>, %arg13: memref<1x1x64xf32, #tpu.memory_space<vmem>>, %arg14: memref<1x64x32xbf16, #tpu.memory_space<vmem>>, %arg15: memref<1x1x32xf32, #tpu.memory_space<vmem>>, %arg16: memref<1x32xf32, #tpu.memory_space<vmem>>, %arg17: memref<1x32xf32, #tpu.memory_space<vmem>>, %arg18: memref<1x8x32xf32, #tpu.memory_space<vmem>>) attributes {dimension_semantics = [#tpu.dimension_semantics<parallel>, #tpu.dimension_semantics<arbitrary>], iteration_bounds = array<i64: 2, 3>, scalar_prefetch = 0 : i64, scratch_operands = 0 : i64, tpu.core_type = #tpu.core_type<tc>, window_params = [{transform_indices = @transform_0, window_bounds = array<i64: 1, 8, 32>}, {transform_indices = @transform_1, window_bounds = array<i64: 1, 32, 32>}, {transform_indices = @transform_2, window_bounds = array<i64: 1, 32, 32>}, {transform_indices = @transform_3, window_bounds = array<i64: 1, 32, 32>}, {transform_indices = @transform_4, window_bounds = array<i64: 1, 32, 32>}, {transform_indices = @transform_5, window_bounds = array<i64: 1, 1, 32>}, {transform_indices = @transform_6, window_bounds = array<i64: 1, 1, 32>}, {transform_indices = @transform_7, window_bounds = array<i64: 1, 1, 32>}, {transform_indices = @transform_8, window_bounds = array<i64: 1, 1, 32>}, {transform_indices = @transform_9, window_bounds = array<i64: 1, 1, 32>}, {transform_indices = @transform_10, window_bounds = array<i64: 1, 32, 64>}, {transform_indices = @transform_11, window_bounds = array<i64: 1, 1, 64>}, {transform_indices = @transform_12, window_bounds = array<i64: 1, 64, 32>}, {transform_indices = @transform_13, window_bounds = array<i64: 1, 1, 32>}, {pipeline_mode = #tpu.pipeline_mode<synchronous>, transform_indices = @transform_14, window_bounds = array<i64: 1, 32>}, {pipeline_mode = #tpu.pipeline_mode<synchronous>, transform_indices = @transform_15, window_bounds = array<i64: 1, 32>}, {transform_indices = @transform_16, window_bounds = array<i64: 1, 8, 32>}]} {
    %c0_i32 = arith.constant 0 : i32
    %0 = arith.cmpi eq, %arg1, %c0_i32 : i32
    %1 = arith.extui %0 : i1 to i32
    %c0_i32_0 = arith.constant 0 : i32
    %2 = arith.cmpi ne, %1, %c0_i32_0 : i32
    scf.if %2 {
      %c0_67 = arith.constant 0 : index
      %c0_68 = arith.constant 0 : index
      %c0_69 = arith.constant 0 : index
      %120 = vector.load %arg2[%c0_67, %c0_68, %c0_69] : memref<1x8x32xf32, #tpu.memory_space<vmem>>, vector<1x8x32xf32>
      %121 = vector.shape_cast %120 : vector<1x8x32xf32> to vector<8x32xf32>
      %c0_70 = arith.constant 0 : index
      %c0_71 = arith.constant 0 : index
      %c0_72 = arith.constant 0 : index
      %122 = vector.load %arg18[%c0_70, %c0_71, %c0_72] : memref<1x8x32xf32, #tpu.memory_space<vmem>>, vector<1x8x32xf32>
      %123 = vector.shape_cast %122 : vector<1x8x32xf32> to vector<8x32xf32>
      %124 = vector.shape_cast %121 : vector<8x32xf32> to vector<1x8x32xf32>
      tpu.vector_store %arg18[%c0_70, %c0_71, %c0_72], %124 {strides = array<i32>} : memref<1x8x32xf32, #tpu.memory_space<vmem>>, vector<1x8x32xf32>,
    } else {
    }
    %c0 = arith.constant 0 : index
    %c0_1 = arith.constant 0 : index
    %c0_2 = arith.constant 0 : index
    %3 = vector.load %arg18[%c0, %c0_1, %c0_2] : memref<1x8x32xf32, #tpu.memory_space<vmem>>, vector<1x8x32xf32>
    %4 = vector.shape_cast %3 : vector<1x8x32xf32> to vector<8x32xf32>
    %c0_3 = arith.constant 0 : index
    %c0_4 = arith.constant 0 : index
    %c0_5 = arith.constant 0 : index
    %5 = vector.load %arg8[%c0_3, %c0_4, %c0_5] : memref<1x1x32xf32, #tpu.memory_space<vmem>>, vector<1x1x32xf32>
    %6 = vector.shape_cast %5 : vector<1x1x32xf32> to vector<1x32xf32>
    %c0_6 = arith.constant 0 : index
    %c0_7 = arith.constant 0 : index
    %c0_8 = arith.constant 0 : index
    %7 = vector.load %arg9[%c0_6, %c0_7, %c0_8] : memref<1x1x32xf32, #tpu.memory_space<vmem>>, vector<1x1x32xf32>
    %8 = vector.shape_cast %7 : vector<1x1x32xf32> to vector<1x32xf32>
    %cst = arith.constant dense<0.000000e+00> : vector<8xf32>
    %9 = vector.multi_reduction <add>, %4, %cst [1] : vector<8x32xf32> to vector<8xf32>
    %10 = vector.shape_cast %9 : vector<8xf32> to vector<8x1xf32>
    %cst_9 = arith.constant 3.200000e+01 : f32
    %11 = vector.broadcast %cst_9 : f32 to vector<8x1xf32>
    %12 = arith.divf %10, %11 : vector<8x1xf32>
    %13 = vector.broadcast %12 : vector<8x1xf32> to vector<8x32xf32>
    %14 = arith.subf %4, %13 : vector<8x32xf32>
    %15 = arith.mulf %14, %14 : vector<8x32xf32>
    %cst_10 = arith.constant dense<0.000000e+00> : vector<8xf32>
    %16 = vector.multi_reduction <add>, %15, %cst_10 [1] : vector<8x32xf32> to vector<8xf32>
    %17 = vector.shape_cast %16 : vector<8xf32> to vector<8x1xf32>
    %cst_11 = arith.constant 3.200000e+01 : f32
    %18 = vector.broadcast %cst_11 : f32 to vector<8x1xf32>
    %19 = arith.divf %17, %18 : vector<8x1xf32>
    %20 = vector.broadcast %12 : vector<8x1xf32> to vector<8x32xf32>
    %21 = arith.subf %4, %20 : vector<8x32xf32>
    %cst_12 = arith.constant 9.99999974E-6 : f32
    %22 = vector.broadcast %cst_12 : f32 to vector<8x1xf32>
    %23 = arith.addf %19, %22 : vector<8x1xf32>
    %24 = math.rsqrt %23 : vector<8x1xf32>
    %25 = vector.broadcast %24 : vector<8x1xf32> to vector<8x32xf32>
    %26 = arith.mulf %21, %25 : vector<8x32xf32>
    %27 = vector.broadcast %6 : vector<1x32xf32> to vector<8x32xf32>
    %28 = arith.mulf %26, %27 : vector<8x32xf32>
    %29 = vector.broadcast %8 : vector<1x32xf32> to vector<8x32xf32>
    %30 = arith.addf %28, %29 : vector<8x32xf32>
    %31 = arith.truncf %30 : vector<8x32xf32> to vector<8x32xbf16>
    %c0_13 = arith.constant 0 : index
    %c0_14 = arith.constant 0 : index
    %c0_15 = arith.constant 0 : index
    %32 = vector.load %arg3[%c0_13, %c0_14, %c0_15] : memref<1x32x32xbf16, #tpu.memory_space<vmem>>, vector<1x32x32xbf16>
    %33 = vector.shape_cast %32 : vector<1x32x32xbf16> to vector<32x32xbf16>
    %cst_16 = arith.constant dense<0.000000e+00> : vector<8x32xf32>
    %34 = tpu.matmul %31, %33, %cst_16 {dimension_numbers = #tpu.dot_dimension_numbers<[1], [0], [0], [1], [0, 0, 1, 1], [], []>} : vector<8x32xbf16>, vector<32x32xbf16>, vector<8x32xf32> -> vector<8x32xf32>
    %c0_17 = arith.constant 0 : index
    %c0_18 = arith.constant 0 : index
    %c0_19 = arith.constant 0 : index
    %35 = vector.load %arg4[%c0_17, %c0_18, %c0_19] : memref<1x32x32xbf16, #tpu.memory_space<vmem>>, vector<1x32x32xbf16>
    %36 = vector.shape_cast %35 : vector<1x32x32xbf16> to vector<32x32xbf16>
    %cst_20 = arith.constant dense<0.000000e+00> : vector<8x32xf32>
    %37 = tpu.matmul %31, %36, %cst_20 {dimension_numbers = #tpu.dot_dimension_numbers<[1], [0], [0], [1], [0, 0, 1, 1], [], []>} : vector<8x32xbf16>, vector<32x32xbf16>, vector<8x32xf32> -> vector<8x32xf32>
    %c0_21 = arith.constant 0 : index
    %c0_22 = arith.constant 0 : index
    %c0_23 = arith.constant 0 : index
    %38 = vector.load %arg5[%c0_21, %c0_22, %c0_23] : memref<1x32x32xbf16, #tpu.memory_space<vmem>>, vector<1x32x32xbf16>
    %39 = vector.shape_cast %38 : vector<1x32x32xbf16> to vector<32x32xbf16>
    %cst_24 = arith.constant dense<0.000000e+00> : vector<8x32xf32>
    %40 = tpu.matmul %31, %39, %cst_24 {dimension_numbers = #tpu.dot_dimension_numbers<[1], [0], [0], [1], [0, 0, 1, 1], [], []>} : vector<8x32xbf16>, vector<32x32xbf16>, vector<8x32xf32> -> vector<8x32xf32>
    %41 = arith.truncf %34 : vector<8x32xf32> to vector<8x32xbf16>
    %42 = arith.truncf %37 : vector<8x32xf32> to vector<8x32xbf16>
    %cst_25 = arith.constant dense<0.000000e+00> : vector<8x8xf32>
    %43 = tpu.matmul %41, %42, %cst_25 {dimension_numbers = #tpu.dot_dimension_numbers<[1], [1], [0], [0], [0, 0, 1, 0], [], []>} : vector<8x32xbf16>, vector<8x32xbf16>, vector<8x8xf32> -> vector<8x8xf32>
    %cst_26 = arith.constant dense<0xFF800000> : vector<8xf32>
    %44 = vector.multi_reduction <maximumf>, %43, %cst_26 [1] : vector<8x8xf32> to vector<8xf32>
    %45 = vector.shape_cast %44 : vector<8xf32> to vector<8x1xf32>
    %46 = vector.broadcast %45 : vector<8x1xf32> to vector<8x8xf32>
    %47 = arith.subf %43, %46 : vector<8x8xf32>
    %48 = math.exp %47 : vector<8x8xf32>
    %cst_27 = arith.constant dense<0.000000e+00> : vector<8xf32>
    %49 = vector.multi_reduction <add>, %48, %cst_27 [1] : vector<8x8xf32> to vector<8xf32>
    %50 = vector.shape_cast %49 : vector<8xf32> to vector<8x1xf32>
    %51 = tpu.reciprocal %50 {approx = true} : vector<8x1xf32> -> vector<8x1xf32>
    %52 = vector.broadcast %51 : vector<8x1xf32> to vector<8x8xf32>
    %53 = arith.mulf %48, %52 : vector<8x8xf32>
    %54 = arith.truncf %53 : vector<8x8xf32> to vector<8x8xbf16>
    %55 = arith.truncf %40 : vector<8x32xf32> to vector<8x32xbf16>
    %cst_28 = arith.constant dense<0.000000e+00> : vector<8x32xf32>
    %56 = tpu.matmul %54, %55, %cst_28 {dimension_numbers = #tpu.dot_dimension_numbers<[1], [0], [0], [1], [0, 0, 1, 1], [], []>} : vector<8x8xbf16>, vector<8x32xbf16>, vector<8x32xf32> -> vector<8x32xf32>
    %57 = arith.truncf %56 : vector<8x32xf32> to vector<8x32xbf16>
    %c0_29 = arith.constant 0 : index
    %c0_30 = arith.constant 0 : index
    %c0_31 = arith.constant 0 : index
    %58 = vector.load %arg6[%c0_29, %c0_30, %c0_31] : memref<1x32x32xbf16, #tpu.memory_space<vmem>>, vector<1x32x32xbf16>
    %59 = vector.shape_cast %58 : vector<1x32x32xbf16> to vector<32x32xbf16>
    %cst_32 = arith.constant dense<0.000000e+00> : vector<8x32xf32>
    %60 = tpu.matmul %57, %59, %cst_32 {dimension_numbers = #tpu.dot_dimension_numbers<[1], [0], [0], [1], [0, 0, 1, 1], [], []>} : vector<8x32xbf16>, vector<32x32xbf16>, vector<8x32xf32> -> vector<8x32xf32>
    %c0_33 = arith.constant 0 : index
    %c0_34 = arith.constant 0 : index
    %c0_35 = arith.constant 0 : index
    %61 = vector.load %arg7[%c0_33, %c0_34, %c0_35] : memref<1x1x32xf32, #tpu.memory_space<vmem>>, vector<1x1x32xf32>
    %62 = vector.shape_cast %61 : vector<1x1x32xf32> to vector<1x32xf32>
    %63 = vector.broadcast %62 : vector<1x32xf32> to vector<8x32xf32>
    %64 = arith.addf %60, %63 : vector<8x32xf32>
    %65 = arith.addf %4, %64 : vector<8x32xf32>
    %c0_36 = arith.constant 0 : index
    %c0_37 = arith.constant 0 : index
    %c0_38 = arith.constant 0 : index
    %66 = vector.load %arg10[%c0_36, %c0_37, %c0_38] : memref<1x1x32xf32, #tpu.memory_space<vmem>>, vector<1x1x32xf32>
    %67 = vector.shape_cast %66 : vector<1x1x32xf32> to vector<1x32xf32>
    %c0_39 = arith.constant 0 : index
    %c0_40 = arith.constant 0 : index
    %c0_41 = arith.constant 0 : index
    %68 = vector.load %arg11[%c0_39, %c0_40, %c0_41] : memref<1x1x32xf32, #tpu.memory_space<vmem>>, vector<1x1x32xf32>
    %69 = vector.shape_cast %68 : vector<1x1x32xf32> to vector<1x32xf32>
    %cst_42 = arith.constant dense<0.000000e+00> : vector<8xf32>
    %70 = vector.multi_reduction <add>, %65, %cst_42 [1] : vector<8x32xf32> to vector<8xf32>
    %71 = vector.shape_cast %70 : vector<8xf32> to vector<8x1xf32>
    %cst_43 = arith.constant 3.200000e+01 : f32
    %72 = vector.broadcast %cst_43 : f32 to vector<8x1xf32>
    %73 = arith.divf %71, %72 : vector<8x1xf32>
    %74 = vector.broadcast %73 : vector<8x1xf32> to vector<8x32xf32>
    %75 = arith.subf %65, %74 : vector<8x32xf32>
    %76 = arith.mulf %75, %75 : vector<8x32xf32>
    %cst_44 = arith.constant dense<0.000000e+00> : vector<8xf32>
    %77 = vector.multi_reduction <add>, %76, %cst_44 [1] : vector<8x32xf32> to vector<8xf32>
    %78 = vector.shape_cast %77 : vector<8xf32> to vector<8x1xf32>
    %cst_45 = arith.constant 3.200000e+01 : f32
    %79 = vector.broadcast %cst_45 : f32 to vector<8x1xf32>
    %80 = arith.divf %78, %79 : vector<8x1xf32>
    %81 = vector.broadcast %73 : vector<8x1xf32> to vector<8x32xf32>
    %82 = arith.subf %65, %81 : vector<8x32xf32>
    %cst_46 = arith.constant 9.99999974E-6 : f32
    %83 = vector.broadcast %cst_46 : f32 to vector<8x1xf32>
    %84 = arith.addf %80, %83 : vector<8x1xf32>
    %85 = math.rsqrt %84 : vector<8x1xf32>
    %86 = vector.broadcast %85 : vector<8x1xf32> to vector<8x32xf32>
    %87 = arith.mulf %82, %86 : vector<8x32xf32>
    %88 = vector.broadcast %67 : vector<1x32xf32> to vector<8x32xf32>
    %89 = arith.mulf %87, %88 : vector<8x32xf32>
    %90 = vector.broadcast %69 : vector<1x32xf32> to vector<8x32xf32>
    %91 = arith.addf %89, %90 : vector<8x32xf32>
    %92 = arith.truncf %91 : vector<8x32xf32> to vector<8x32xbf16>
    %c0_47 = arith.constant 0 : index
    %c0_48 = arith.constant 0 : index
    %c0_49 = arith.constant 0 : index
    %93 = vector.load %arg12[%c0_47, %c0_48, %c0_49] : memref<1x32x64xbf16, #tpu.memory_space<vmem>>, vector<1x32x64xbf16>
    %94 = vector.shape_cast %93 : vector<1x32x64xbf16> to vector<32x64xbf16>
    %cst_50 = arith.constant dense<0.000000e+00> : vector<8x64xf32>
    %95 = tpu.matmul %92, %94, %cst_50 {dimension_numbers = #tpu.dot_dimension_numbers<[1], [0], [0], [1], [0, 0, 1, 1], [], []>} : vector<8x32xbf16>, vector<32x64xbf16>, vector<8x64xf32> -> vector<8x64xf32>
    %c0_51 = arith.constant 0 : index
    %c0_52 = arith.constant 0 : index
    %c0_53 = arith.constant 0 : index
    %96 = vector.load %arg13[%c0_51, %c0_52, %c0_53] : memref<1x1x64xf32, #tpu.memory_space<vmem>>, vector<1x1x64xf32>
    %97 = vector.shape_cast %96 : vector<1x1x64xf32> to vector<1x64xf32>
    %98 = vector.broadcast %97 : vector<1x64xf32> to vector<8x64xf32>
    %99 = arith.addf %95, %98 : vector<8x64xf32>
    %cst_54 = arith.constant 0.000000e+00 : f32
    %100 = vector.broadcast %cst_54 : f32 to vector<8x64xf32>
    %101 = arith.cmpf ogt, %99, %100 : vector<8x64xf32>
    %cst_55 = arith.constant 1.000000e-01 : f32
    %102 = vector.broadcast %cst_55 : f32 to vector<8x64xf32>
    %103 = arith.mulf %102, %99 : vector<8x64xf32>
    %104 = arith.select %101, %99, %103 : vector<8x64xi1>, vector<8x64xf32>
    %105 = arith.truncf %104 : vector<8x64xf32> to vector<8x64xbf16>
    %c0_56 = arith.constant 0 : index
    %c0_57 = arith.constant 0 : index
    %c0_58 = arith.constant 0 : index
    %106 = vector.load %arg14[%c0_56, %c0_57, %c0_58] : memref<1x64x32xbf16, #tpu.memory_space<vmem>>, vector<1x64x32xbf16>
    %107 = vector.shape_cast %106 : vector<1x64x32xbf16> to vector<64x32xbf16>
    %cst_59 = arith.constant dense<0.000000e+00> : vector<8x32xf32>
    %108 = tpu.matmul %105, %107, %cst_59 {dimension_numbers = #tpu.dot_dimension_numbers<[1], [0], [0], [1], [0, 0, 1, 1], [], []>} : vector<8x64xbf16>, vector<64x32xbf16>, vector<8x32xf32> -> vector<8x32xf32>
    %c0_60 = arith.constant 0 : index
    %c0_61 = arith.constant 0 : index
    %c0_62 = arith.constant 0 : index
    %109 = vector.load %arg15[%c0_60, %c0_61, %c0_62] : memref<1x1x32xf32, #tpu.memory_space<vmem>>, vector<1x1x32xf32>
    %110 = vector.shape_cast %109 : vector<1x1x32xf32> to vector<1x32xf32>
    %111 = vector.broadcast %110 : vector<1x32xf32> to vector<8x32xf32>
    %112 = arith.addf %108, %111 : vector<8x32xf32>
    %113 = arith.addf %65, %112 : vector<8x32xf32>
    %c0_63 = arith.constant 0 : index
    %c0_64 = arith.constant 0 : index
    %c0_65 = arith.constant 0 : index
    %114 = vector.load %arg18[%c0_63, %c0_64, %c0_65] : memref<1x8x32xf32, #tpu.memory_space<vmem>>, vector<1x8x32xf32>
    %115 = vector.shape_cast %114 : vector<1x8x32xf32> to vector<8x32xf32>
    %116 = vector.shape_cast %113 : vector<8x32xf32> to vector<1x8x32xf32>
    tpu.vector_store %arg18[%c0_63, %c0_64, %c0_65], %116 {strides = array<i32>} : memref<1x8x32xf32, #tpu.memory_space<vmem>>, vector<1x8x32xf32>,
    %c2_i32 = arith.constant 2 : i32
    %117 = arith.cmpi eq, %arg1, %c2_i32 : i32
    %118 = arith.extui %117 : i1 to i32
    %c0_i32_66 = arith.constant 0 : i32
    %119 = arith.cmpi ne, %118, %c0_i32_66 : i32
    scf.if %119 {
      %c0_67 = arith.constant 0 : index
      %c0_68 = arith.constant 0 : index
      %120 = vector.load %arg16[%c0_67, %c0_68] : memref<1x32xf32, #tpu.memory_space<vmem>>, vector<1x32xf32>
      %c0_69 = arith.constant 0 : index
      %c0_70 = arith.constant 0 : index
      %121 = vector.load %arg17[%c0_69, %c0_70] : memref<1x32xf32, #tpu.memory_space<vmem>>, vector<1x32xf32>
      %cst_71 = arith.constant dense<0.000000e+00> : vector<8xf32>
      %122 = vector.multi_reduction <add>, %113, %cst_71 [1] : vector<8x32xf32> to vector<8xf32>
      %123 = vector.shape_cast %122 : vector<8xf32> to vector<8x1xf32>
      %cst_72 = arith.constant 3.200000e+01 : f32
      %124 = vector.broadcast %cst_72 : f32 to vector<8x1xf32>
      %125 = arith.divf %123, %124 : vector<8x1xf32>
      %126 = vector.broadcast %125 : vector<8x1xf32> to vector<8x32xf32>
      %127 = arith.subf %113, %126 : vector<8x32xf32>
      %128 = arith.mulf %127, %127 : vector<8x32xf32>
      %cst_73 = arith.constant dense<0.000000e+00> : vector<8xf32>
      %129 = vector.multi_reduction <add>, %128, %cst_73 [1] : vector<8x32xf32> to vector<8xf32>
      %130 = vector.shape_cast %129 : vector<8xf32> to vector<8x1xf32>
      %cst_74 = arith.constant 3.200000e+01 : f32
      %131 = vector.broadcast %cst_74 : f32 to vector<8x1xf32>
      %132 = arith.divf %130, %131 : vector<8x1xf32>
      %133 = vector.broadcast %125 : vector<8x1xf32> to vector<8x32xf32>
      %134 = arith.subf %113, %133 : vector<8x32xf32>
      %cst_75 = arith.constant 9.99999974E-6 : f32
      %135 = vector.broadcast %cst_75 : f32 to vector<8x1xf32>
      %136 = arith.addf %132, %135 : vector<8x1xf32>
      %137 = math.rsqrt %136 : vector<8x1xf32>
      %138 = vector.broadcast %137 : vector<8x1xf32> to vector<8x32xf32>
      %139 = arith.mulf %134, %138 : vector<8x32xf32>
      %140 = vector.broadcast %120 : vector<1x32xf32> to vector<8x32xf32>
      %141 = arith.mulf %139, %140 : vector<8x32xf32>
      %142 = vector.broadcast %121 : vector<1x32xf32> to vector<8x32xf32>
      %143 = arith.addf %141, %142 : vector<8x32xf32>
      %c0_76 = arith.constant 0 : index
      %c0_77 = arith.constant 0 : index
      %c0_78 = arith.constant 0 : index
      %144 = vector.load %arg18[%c0_76, %c0_77, %c0_78] : memref<1x8x32xf32, #tpu.memory_space<vmem>>, vector<1x8x32xf32>
      %145 = vector.shape_cast %144 : vector<1x8x32xf32> to vector<8x32xf32>
      %146 = vector.shape_cast %143 : vector<8x32xf32> to vector<1x8x32xf32>
      tpu.vector_store %arg18[%c0_76, %c0_77, %c0_78], %146 {strides = array<i32>} : memref<1x8x32xf32, #tpu.memory_space<vmem>>, vector<1x8x32xf32>,
    } else {
    }
    return
  }
  func.func @transform_0(%arg0: i32, %arg1: i32) -> (i32, i32, i32) {
    %c0_i32 = arith.constant 0 : i32
    %c0_i32_0 = arith.constant 0 : i32
    %c0_i32_1 = arith.constant 0 : i32
    return %arg0, %c0_i32, %c0_i32_0 : i32, i32, i32
  }
  func.func @transform_1(%arg0: i32, %arg1: i32) -> (i32, i32, i32) {
    %c0_i32 = arith.constant 0 : i32
    %c0_i32_0 = arith.constant 0 : i32
    %c0_i32_1 = arith.constant 0 : i32
    return %arg1, %c0_i32, %c0_i32_0 : i32, i32, i32
  }
  func.func @transform_2(%arg0: i32, %arg1: i32) -> (i32, i32, i32) {
    %c0_i32 = arith.constant 0 : i32
    %c0_i32_0 = arith.constant 0 : i32
    %c0_i32_1 = arith.constant 0 : i32
    return %arg1, %c0_i32, %c0_i32_0 : i32, i32, i32
  }
  func.func @transform_3(%arg0: i32, %arg1: i32) -> (i32, i32, i32) {
    %c0_i32 = arith.constant 0 : i32
    %c0_i32_0 = arith.constant 0 : i32
    %c0_i32_1 = arith.constant 0 : i32
    return %arg1, %c0_i32, %c0_i32_0 : i32, i32, i32
  }
  func.func @transform_4(%arg0: i32, %arg1: i32) -> (i32, i32, i32) {
    %c0_i32 = arith.constant 0 : i32
    %c0_i32_0 = arith.constant 0 : i32
    %c0_i32_1 = arith.constant 0 : i32
    return %arg1, %c0_i32, %c0_i32_0 : i32, i32, i32
  }
  func.func @transform_5(%arg0: i32, %arg1: i32) -> (i32, i32, i32) {
    %c0_i32 = arith.constant 0 : i32
    %c0_i32_0 = arith.constant 0 : i32
    %c0_i32_1 = arith.constant 0 : i32
    return %arg1, %c0_i32, %c0_i32_0 : i32, i32, i32
  }
  func.func @transform_6(%arg0: i32, %arg1: i32) -> (i32, i32, i32) {
    %c0_i32 = arith.constant 0 : i32
    %c0_i32_0 = arith.constant 0 : i32
    %c0_i32_1 = arith.constant 0 : i32
    return %arg1, %c0_i32, %c0_i32_0 : i32, i32, i32
  }
  func.func @transform_7(%arg0: i32, %arg1: i32) -> (i32, i32, i32) {
    %c0_i32 = arith.constant 0 : i32
    %c0_i32_0 = arith.constant 0 : i32
    %c0_i32_1 = arith.constant 0 : i32
    return %arg1, %c0_i32, %c0_i32_0 : i32, i32, i32
  }
  func.func @transform_8(%arg0: i32, %arg1: i32) -> (i32, i32, i32) {
    %c0_i32 = arith.constant 0 : i32
    %c0_i32_0 = arith.constant 0 : i32
    %c0_i32_1 = arith.constant 0 : i32
    return %arg1, %c0_i32, %c0_i32_0 : i32, i32, i32
  }
  func.func @transform_9(%arg0: i32, %arg1: i32) -> (i32, i32, i32) {
    %c0_i32 = arith.constant 0 : i32
    %c0_i32_0 = arith.constant 0 : i32
    %c0_i32_1 = arith.constant 0 : i32
    return %arg1, %c0_i32, %c0_i32_0 : i32, i32, i32
  }
  func.func @transform_10(%arg0: i32, %arg1: i32) -> (i32, i32, i32) {
    %c0_i32 = arith.constant 0 : i32
    %c0_i32_0 = arith.constant 0 : i32
    %c0_i32_1 = arith.constant 0 : i32
    return %arg1, %c0_i32, %c0_i32_0 : i32, i32, i32
  }
  func.func @transform_11(%arg0: i32, %arg1: i32) -> (i32, i32, i32) {
    %c0_i32 = arith.constant 0 : i32
    %c0_i32_0 = arith.constant 0 : i32
    %c0_i32_1 = arith.constant 0 : i32
    return %arg1, %c0_i32, %c0_i32_0 : i32, i32, i32
  }
  func.func @transform_12(%arg0: i32, %arg1: i32) -> (i32, i32, i32) {
    %c0_i32 = arith.constant 0 : i32
    %c0_i32_0 = arith.constant 0 : i32
    %c0_i32_1 = arith.constant 0 : i32
    return %arg1, %c0_i32, %c0_i32_0 : i32, i32, i32
  }
  func.func @transform_13(%arg0: i32, %arg1: i32) -> (i32, i32, i32) {
    %c0_i32 = arith.constant 0 : i32
    %c0_i32_0 = arith.constant 0 : i32
    %c0_i32_1 = arith.constant 0 : i32
    return %arg1, %c0_i32, %c0_i32_0 : i32, i32, i32
  }
  func.func @transform_14(%arg0: i32, %arg1: i32) -> (i32, i32) {
    %c0_i32 = arith.constant 0 : i32
    %c0_i32_0 = arith.constant 0 : i32
    %c0_i32_1 = arith.constant 0 : i32
    return %c0_i32, %c0_i32_0 : i32, i32
  }
  func.func @transform_15(%arg0: i32, %arg1: i32) -> (i32, i32) {
    %c0_i32 = arith.constant 0 : i32
    %c0_i32_0 = arith.constant 0 : i32
    %c0_i32_1 = arith.constant 0 : i32
    return %c0_i32, %c0_i32_0 : i32, i32
  }
  func.func @transform_16(%arg0: i32, %arg1: i32) -> (i32, i32, i32) {
    %c0_i32 = arith.constant 0 : i32
    %c0_i32_0 = arith.constant 0 : i32
    %c0_i32_1 = arith.constant 0 : i32
    return %arg0, %c0_i32, %c0_i32_0 : i32, i32, i32
  }
}

</mosaic_0001>

<bundles_post_ra>
// kernel: transformer_encoder.1
= control target key start
LH: loop header
LB: loop body
LE: loop exit
PB: predicated region body
PF: predicated region fallthrough
CT: control target
= control target key end

     0   :  { %s2030_s0 = inlined_call_operand.vmem [shape: f32[2,8,32], index: 0, kind: input, shape index: {}]   ;;  %s2031_s1 = inlined_call_operand.vmem [shape: bf16[3,32,32], index: 1, kind: input, shape index: {}]   ;;  %s2032_s2 = inlined_call_operand.vmem [shape: bf16[3,32,32], index: 2, kind: input, shape index: {}]   ;;  %s2033_s3 = inlined_call_operand.vmem [shape: bf16[3,32,32], index: 3, kind: input, shape index: {}]   ;;  %s2034_s4 = inlined_call_operand.vmem [shape: bf16[3,32,32], index: 4, kind: input, shape index: {}]   ;;  %s2035_s5 = inlined_call_operand.vmem [shape: f32[3,1,32], index: 5, kind: input, shape index: {}]   ;;  %s2036_s6 = inlined_call_operand.vmem [shape: f32[3,1,32], index: 6, kind: input, shape index: {}]   ;;  %s2037_s7 = inlined_call_operand.vmem [shape: f32[3,1,32], index: 7, kind: input, shape index: {}]   ;;  %s2038_s8 = inlined_call_operand.vmem [shape: f32[3,1,32], index: 8, kind: input, shape index: {}]   ;;  %s2039_s9 = inlined_call_operand.vmem [shape: f32[3,1,32], index: 9, kind: input, shape index: {}]   ;;  %s2040_s10 = inlined_call_operand.vmem [shape: bf16[3,32,64], index: 10, kind: input, shape index: {}]   ;;  %s2041_s11 = inlined_call_operand.vmem [shape: f32[3,1,64], index: 11, kind: input, shape index: {}]   ;;  %s2042_s12 = inlined_call_operand.vmem [shape: bf16[3,64,32], index: 12, kind: input, shape index: {}]   ;;  %s2043_s13 = inlined_call_operand.vmem [shape: f32[3,1,32], index: 13, kind: input, shape index: {}]   ;;  %s2044_s14 = inlined_call_operand.vmem [shape: f32[1,32], index: 14, kind: input, shape index: {}]   ;;  %s2045_s15 = inlined_call_operand.vmem [shape: f32[1,32], index: 15, kind: input, shape index: {}]   ;;  %s2046_s16 = inlined_call_operand.hbm [shape: f32[2,8,32], index: 16, kind: output, shape index: {}]  }
   0x1   :  { %2065 = sst [smem:[#allocation21_spill]] %s2030_s0 }
   0x2   :  { %2066 = sst [smem:[#allocation22_spill]] %s2031_s1 }
   0x3   :  { %2067 = sst [smem:[#allocation23_spill]] %s2032_s2 }
   0x4   :  { %2068 = sst [smem:[#allocation24_spill]] %s2033_s3 }
   0x5   :  { %2069 = sst [smem:[#allocation25_spill]] %s2034_s4 }
   0x6   :  { %2070 = sst [smem:[#allocation26_spill]] %s2044_s14 }
   0x7   :  { %2071 = sst [smem:[#allocation27_spill]] %s2045_s15 }
   0x8   :  { %2072 = sst [smem:[#allocation28_spill]] %s2046_s16 }
   0x9   :  { %21 = vsyncpa [#allocation3], 0 }
   0xa   :  { %23 = vsyncpa [#allocation3 + $0x1], 0  ;;  %s1750_s21 = smov 0   ;;  %s1752_s22 = smov 0  }
   0xb   :  { %s1754_s23 = smov 0   ;;  %s1756_s24 = smov 0  }
   0xc   :  { %s1758_s25 = smov 0   ;;  %s1760_s26 = smov 0  }
   0xd   :  { %s1762_s27 = smov 0   ;;  %s1764_s28 = smov 0  }
   0xe LB: > { %2073 = sst [smem:[#allocation5_spill]] %s1634_s21  ;;  %s1366_s29 = sadd.s32 4294967295, %s1662_s28   ;;  %s1662_s28 = sphi %s1764_s28, %s29_s28   ;;  %s1658_s27 = sphi %s1762_s27, %s2120_s27   ;;  %s1654_s26 = sphi %s1760_s26, %s2119_s26   ;;  %s1650_s25 = sphi %s1758_s25, %s2118_s25   ;;  %s1646_s24 = sphi %s1756_s24, %s2117_s24   ;;  %s1642_s23 = sphi %s1754_s23, %s2116_s23   ;;  %s1638_s22 = sphi %s1752_s22, %s2115_s22   ;;  %s1634_s21 = sphi %s1750_s21, %s2114_s21  }
   0xf   : > { %2074 = sst [smem:[#allocation6_spill]] %s1638_s22  ;;  %s1367_s30 = sadd.s32 4294967294, %s1662_s28  }
  0x10   : > { %2075 = sst [smem:[#allocation7_spill]] %s1642_s23  ;;  %s38_s0 = sadd.s32 1, %s1654_s26 }
  0x11   : > { %2076 = sst [smem:[#allocation8_spill]] %s1646_s24  ;;  %p39_p0 = scmp.ge.s32.totalorder %s38_s0, 3 }
  0x12   : > { %2077 = sst [smem:[#allocation9_spill]] %s1650_s25  ;;  %s41_s17 = sadd.s32 1, %s1658_s27 }
  0x13   : > { %2078 = sst [smem:[#allocation10_spill]] %s1654_s26  ;;  %p464_p1 = scmp.ne.s32.totalorder %s1642_s23, %s1638_s22 }
  0x14   : > { %2079 = sst [smem:[#allocation11_spill]] %s1658_s27  ;;  %p465_p2 = scmp.eq.s32.totalorder %s1366_s29, 5 }
  0x15   : > { %2080 = sst [smem:[#allocation12_spill]] %s1662_s28  ;;  %s2122_s0 = smov (%p39_p0, %s38_s0), 0 }
  0x16   : > { %2081 = sst [smem:[#allocation13_spill]] %s2122_s0  ;;  %s2124_s17 = smov (!%p39_p0, %s41_s17), %s1658_s27 }
  0x17   : > { %p1799_p3 = por %p465_p2, %p464_p1  ;;  %p470_p4 = scmp.ne.s32.totalorder %s1638_s22, %s1634_s21 }
  0x18   : > { %p43_p5 = scmp.ge.s32.totalorder %s2124_s17, 2  ;;  %p471_p6 = scmp.eq.s32.totalorder %s1367_s30, 5 }
  0x19   : > { %s2082_s18 = scalar_select %p1799_p3, 1, 0 }
  0x1a   : > { %p1370_p7 = scmp.ge.s32.totalorder %s1662_s28, 1  ;;  %p592_p8 = scmp.lt.s32.totalorder %s1662_s28, 7 }
  0x1b   : > { %2083 = sst [smem:[#allocation14_spill]] %s2082_s18  ;;  %s2126_s17 = smov (%p43_p5, %s2124_s17), 0 }
  0x1c   : > { %2084 = sst [smem:[#allocation15_spill]] %s2126_s17  ;;  %p1809_p9 = por %p471_p6, %p470_p4 }
  0x1d   : > { %p593_p10 = pnand %p1370_p7, %p592_p8  ;;  %s451_s20 = ssub.s32 %s1658_s27, %s2126_s17 }
  0x1e   : > { %s2085_s19 = scalar_select %p1809_p9, 1, 0 }
  0x1f   : > { %s454_s29 = sadd.s32 1, %s1642_s23  ;;  %p452_p11 = scmp.eq.s32.totalorder %s451_s20, 0 }
  0x20   : > { %2086 = sst [smem:[#allocation16_spill]] %s2085_s19  ;;  %596 = sbr.rel (%p593_p10) target bundleno = 1962 (0x7aa), region = 84 }
  0x21   : > { %s1817_s0 = scalar_select %p452_p11, %s1642_s23, %s454_s29  }
  0x23   : > { %2087 = sst [smem:[#allocation17_spill]] %s1817_s0 }
  0x25   : > { %s2053_s30 = sand.u32 1, %s1638_s22   ;;  %p692_p12 = scmp.lt.s32.totalorder %s1650_s25, 1 }
  0x26   : > { %s1371_s26 = sshll.u32 %s2053_s30, 3  ;;  %p696_p13 = scmp.lt.s32.totalorder %s1646_s24, 2 }
  0x27   : > { %s693_s21 = scalar_select %p692_p12, %s1650_s25, 1 }
  0x28   : > { %s1826_s19 = scalar_select %p696_p13, %s1646_s24, 2 }
  0x29   : > { %s1372_s20 = sshll.u32 %s693_s21, 3  ;;  %s2088_s27 = sld [smem:[#allocation21_spill]] }
  0x2a   : > { %s1455_s23 = sshll.u32 %s1826_s19, 4  ;;  %s2089_s1 = sld [smem:[#allocation22_spill]] }
  0x2b   : > { %s2090_s2 = sld [smem:[#allocation23_spill]]  ;;  %s721_s22 = scalar_lea.vmem %s2036_s6, %s1826_s19 }
  0x2c   : > { %s2092_s3 = sld [smem:[#allocation24_spill]]  ;;  %s738_s30 = scalar_lea.vmem %s2041_s11, %s1826_s19 }
  0x2d   : > { %s2094_s4 = sld [smem:[#allocation25_spill]]  ;;  %s1460_s28 = sshll.u32 %s1826_s19, 5 }
  0x2e   : > { %s1891_s24 = scalar_lea.vmem [#allocation2], %s1371_s26  ;;  %s2096_s17 = sld [smem:[#allocation8_spill]] }
  0x2f   : > { %s695_s0 = scalar_lea.vmem %s2088_s27, %s1372_s20  ;;  %s1875_s20 = scalar_lea.vmem %s2040_s10, %s1455_s23 }
  0x30   : > { %s1835_s16 = scalar_lea.vmem %s2089_s1, %s1455_s23 }
  0x31   : > { %s1840_s25 = scalar_lea.vmem %s2090_s2, %s1455_s23 }
  0x32   : > { %2091 = sst [smem:[#allocation18_spill]] %s1840_s25  ;;  %s1845_s21 = scalar_lea.vmem %s2092_s3, %s1455_s23 }
  0x33   : > { %2093 = sst [smem:[#allocation19_spill]] %s1845_s21  ;;  %s1850_s27 = scalar_lea.vmem %s2094_s4, %s1455_s23 }
  0x34   : > { %2095 = sst [smem:[#allocation20_spill]] %s1850_s27  ;;  %s727_s3 = scalar_lea.vmem %s2038_s8, %s1826_s19 }
  0x35   : > { %s1885_s25 = scalar_lea.vmem %s2042_s12, %s1460_s28  ;;  %s746_s21 = scalar_lea.vmem %s2043_s13, %s1826_s19 }
  0x36   : > { %p1385_p0 = scmp.ne.s32.totalorder %s2096_s17, 0 }
  0x38   : > { %751 = sbr.rel (%p1385_p0) target bundleno = 63 (0x3f), region = 88 }
  0x3d   : > { %v752_v0 = vld [vmem:[%s695_s0] sm:$0xff]  ;;  %vm753_vm0 = vcmask 261120  }
  0x3e   : > { %754 = vst.msk [vmem:[%s1891_s24] sm:$0xff] %vm753_vm0, %v752_v0 }
  0x3f PF: > { %vm758_vm1 = vcmask 261120   ;;  %v1664_v3 = vmov 32.0   ;;  %s2097_s4 = sld [smem:[#allocation18_spill]]  ;;  %v1462_v15 = vld [vmem:[%s1835_s16 + $0x8] sm:$0xff]  ;;  %v1461_v18 = vld [vmem:[%s1835_s16] sm:$0xff]  ;;  %s2099_s28 = scalar_lea.vmem %s2037_s7, %s1826_s19  ;;  %vm925_vm6 = vcmask 1043456  }
  0x40   : > { %1554 = vrcp.f32 %v1664_v3  ;;  %s2098_s23 = sld [smem:[#allocation19_spill]]  ;;  %822 = vmatpush.bf16.msra.mxu0 %v1462_v15  ;;  %v1547_v30 = vld [vmem:[%s721_s22] ss:$0 sm:$0xff]  ;;  %vm908_vm7 = vcmask 64512   ;;  %s2101_s1 = scalar_lea.vmem %s2035_s5, %s1826_s19  ;;  %vm1089_vm12 = vcmask 523264  }
  0x41   : > { %v1548_v33 = vld [vmem:[%s2099_s28] ss:$0 sm:$0xff]  ;;  %s2100_s22 = sld [smem:[#allocation20_spill]]  ;;  %s2102_s15 = scalar_lea.vmem %s2039_s9, %s1826_s19 }
  0x42   : > { %v1469_v15 = vld [vmem:[%s1875_s20] sm:$0xff] }
  0x44   : > { %823 = vmatpush.bf16.msra.mxu0 %v1461_v18  ;;  %v1473_v18 = vld [vmem:[%s1885_s25 + $0x10] sm:$0xff] }
  0x45   : > { %v1896_v1 = vld [vmem:[%s1891_s24] sm:$0xff] }
  0x46   : > { %v759_v2 = vsel %vm758_vm1, %v1896_v1, 0.0  ;;  %v1555_v4 = vpop.eup %1554  ;;  %v1464_v16 = vld [vmem:[%s2097_s4 + $0x8] sm:$0xff]  ;;  %v1463_v19 = vld [vmem:[%s2097_s4] sm:$0xff] }
  0x47   : > { %760 = vadd.xlane.f32.xlu0 %v759_v2  ;;  %v763_v5 = vmul.f32 32.0, %v1555_v4  ;;  %vm767_vm2 = vweird.f32 %v1555_v4  ;;  %v1466_v17 = vld [vmem:[%s2098_s23 + $0x8] sm:$0xff]  ;;  %851 = vmatpush.bf16.msra.mxu1 %v1464_v16  ;;  %v1465_v20 = vld [vmem:[%s2098_s23] sm:$0xff]  ;;  %v1474_v16 = vld [vmem:[%s1885_s25 + $0x18] sm:$0xff] }
  0x48   : > { %880 = vmatpush.bf16.msra.mxu2 %v1466_v17  ;;  %v1468_v56 = vld [vmem:[%s2100_s22 + $0x8] sm:$0xff]  ;;  %v1467_v57 = vld [vmem:[%s2100_s22] sm:$0xff] }
  0x49   : > { %v764_v6 = vsub.f32 1.0, %v763_v5  ;;  %v1549_v2 = vld [vmem:[%s2101_s1] ss:$0 sm:$0xff] }
  0x4b   : > { %v765_v7 = vmul.f32 %v1555_v4, %v764_v6  ;;  %852 = vmatpush.bf16.msra.mxu1 %v1463_v19 }
  0x4c   : > { %881 = vmatpush.bf16.msra.mxu2 %v1465_v20 }
  0x4d   : > { %v766_v8 = vadd.f32 %v1555_v4, %v765_v7 }
  0x4f   : > { %v1900_v9 = vsel %vm767_vm2, %v1555_v4, %v766_v8  ;;  %972 = vmatpush.bf16.msrb.mxu1 %v1468_v56 }
  0x53   : > { %973 = vmatpush.bf16.msrb.mxu1 %v1467_v57 }
  0xba   : > { %v761_v10 = vpop.xlane.xlu0 %760 }
  0xbb   : > { %v769_v11 = vmul.f32 %v1900_v9, %v761_v10 }
  0xbd   : > { %v770_v12 = vsub.f32 %v1896_v1, %v769_v11 }
  0xbf   : > { %v771_v13 = vmul.f32 %v770_v12, %v770_v12 }
  0xc1   : > { %v772_v14 = vsel %vm758_vm1, %v771_v13, 0.0 }
  0xc2   : > { %773 = vadd.xlane.f32.xlu0 %v772_v14  ;;  %v1470_v14 = vld [vmem:[%s1875_s20 + $0x8] sm:$0xff] }
  0xc3   : > { %1042 = vmatpush.bf16.msrb.mxu2 %v1470_v14 }
  0xc7   : > { %1043 = vmatpush.bf16.msrb.mxu2 %v1469_v15 }
 0x135   : > { %v774_v21 = vpop.xlane.xlu0 %773 }
 0x136   : > { %v775_v22 = vmul.f32 %v774_v21, %v1900_v9 }
 0x138   : > { %v776_v23 = vadd.f32 1e-05, %v775_v22 }
 0x13a   : > { %1556 = vrsqrt.f32 %v776_v23  ;;  %vm783_vm4 = vweird.f32 %v776_v23 }
 0x140   : > { %v1557_v24 = vpop.eup %1556 }
 0x141   : > { %v778_v25 = vmul.f32 %v1557_v24, %v776_v23  ;;  %vm784_vm3 = vweird.f32 %v1557_v24 }
 0x142   : > { %vm785_vm5 = vmor %vm783_vm4, %vm784_vm3 }
 0x143   : > { %v779_v26 = vmul.f32 %v1557_v24, %v778_v25 }
 0x145   : > { %v780_v27 = vmul.f32 0.5, %v779_v26  ;;  %v1550_v26 = vld [vmem:[%s727_s3] ss:$0 sm:$0xff] }
 0x147   : > { %v781_v28 = vsub.f32 1.5, %v780_v27 }
 0x149   : > { %v782_v29 = vmul.f32 %v1557_v24, %v781_v28 }
 0x14b   : > { %v786_v31 = vsel %vm785_vm5, %v1557_v24, %v782_v29  ;;  %v1551_v29 = vld [vmem:[%s2102_s15] ss:$0 sm:$0xff] }
 0x14c   : > { %v787_v32 = vmul.f32 %v786_v31, %v770_v12 }
 0x14e   : > { %v791_v34 = vmul.f32 %v1547_v30, %v787_v32 }
 0x150   : > { %v795_v35 = vadd.f32 %v1548_v33, %v791_v34  ;;  %v1472_v33 = vld [vmem:[%s1885_s25 + $0x8] sm:$0xff]  ;;  %v1471_v34 = vld [vmem:[%s1885_s25] sm:$0xff]  ;;  %s2103_s25 = sld [smem:[#allocation8_spill]] }
 0x152   : > { %v796_v36 = vpack.c.bf16 %v795_v35, %v795_v35  ;;  %v1552_v35 = vld [vmem:[%s738_s30] ss:$0 sm:$0xff] }
 0x154   : > { %1394 = vmatmul.msk.bf16.vlgmr.msra.gmra.mxu0 %vm758_vm1, %v796_v36  ;;  %1403 = vmatmul.msk.bf16.vlgmr.msra.gmra.mxu1 %vm758_vm1, %v796_v36 }
 0x155   : > { %1412 = vmatmul.msk.bf16.vlgmr.msra.gmra.mxu2 %vm758_vm1, %v796_v36 }
 0x156   : > { %p1450_p1 = scmp.ne.s32.totalorder %s2103_s25, 2 }
 0x157   : > { %s2105_s27 = sld [smem:[#allocation27_spill]] (!%p1450_p1) }
 0x1d1   : > { %v825_v37 = vpop.f32.mrf.mxu0  ;;  %v854_v38 = vpop.f32.mrf.mxu1 }
 0x1d2   : > { %v888_v39 = vpack.c.bf16 %v854_v38, %v854_v38  ;;  %v887_v45 = vpack.c.bf16 %v825_v37, %v825_v37 }
 0x1d4   : > { %v893_v40 = vsel %vm758_vm1, %v888_v39, 0 }
 0x1d5   : > { %902 = vmatpush.bf16.xpose.msra.mxu3 %v893_v40 }
 0x1d8   : > { %v883_v41 = vpop.f32.mrf.mxu2 }
 0x1d9   : > { %v921_v42 = vpack.c.bf16 %v883_v41, %v883_v41  ;;  %v827_v43 = vpop.f32.mrf.mxu0  ;;  %v856_v44 = vpop.f32.mrf.mxu1 }
 0x1db   : > { %v927_v46 = vsel %vm925_vm6, %v921_v42, 0  ;;  %v1553_v42 = vld [vmem:[%s746_s21] ss:$0 sm:$0xff]  ;;  %s2104_s21 = sld [smem:[#allocation26_spill]] (!%p1450_p1) }
 0x1dc   : > { %936 = vmatpush.bf16.msrb.mxu0 %v927_v46  ;;  %1413 = vmatmul.msk.bf16.vlgmr.msra.gmra.mxu3 %vm758_vm1, %v887_v45 }
 0x1dd   : > { %1097 = vmatpush.bf16.msrb.mxu3 %v1474_v16 }
 0x1e0   : > { %v885_v47 = vpop.f32.mrf.mxu2 }
 0x1e1   : > { %1098 = vmatpush.bf16.msrb.mxu3 %v1473_v18 }
 0x1e5   : > { %1099 = vmatpush.bf16.msrb.mxu3 %v1472_v33 }
 0x1e9   : > { %1100 = vmatpush.bf16.msrb.mxu3 %v1471_v34 }
 0x25f   : > { %v904_v48 = vpop.f32.mrf.mxu3 }
 0x260   : > { %v909_v49 = vsel %vm908_vm7, %v904_v48, -inf }
 0x261   : > { %910 = vmax.xlane.f32.xlu1 %v909_v49 }
 0x267   : > { %v906_v50 = vpop.f32.mrf.mxu3 }
 0x2d4   : > { %v911_v51 = vpop.xlane.xlu1 %910 }
 0x2d5   : > { %v912_v52 = vsub.f32 %v904_v48, %v911_v51 }
 0x2d7   : > { %v913_v53 = vmul.f32 1.442695, %v912_v52 }
 0x2d9   : > { %1558 = vpow2.f32 %v913_v53 }
 0x2df   : > { %v1559_v54 = vpop.eup %1558 }
 0x2e0   : > { %v915_v55 = vsel %vm908_vm7, %v1559_v54, 0.0 }
 0x2e1   : > { %916 = vadd.xlane.f32.xlu1 %v915_v55 }
 0x354   : > { %v917_v58 = vpop.xlane.xlu1 %916 }
 0x355   : > { %1560 = vrcp.f32 %v917_v58 }
 0x35b   : > { %v1561_v59 = vpop.eup %1560 }
 0x35c   : > { %v919_v60 = vmul.f32 %v1561_v59, %v1559_v54 }
 0x35e   : > { %v920_v61 = vpack.c.bf16 %v919_v60, %v919_v60 }
 0x360   : > { %1414 = vmatmul.msk.bf16.vlgmr.msrb.gmra.mxu0 %vm908_vm7, %v920_v61 }
 0x3dd   : > { %v938_v62 = vpop.f32.mrf.mxu0 }
 0x3de   : > { %v942_v63 = vpack.c.bf16 %v938_v62, %v938_v62 }
 0x3e0   : > { %1423 = vmatmul.msk.bf16.vlgmr.msrb.gmra.mxu1 %vm758_vm1, %v942_v63 }
 0x3e5   : > { %v940_v0 = vpop.f32.mrf.mxu0 }
 0x45d   : > { %v975_v3 = vpop.f32.mrf.mxu1 }
 0x45e   : > { %v976_v4 = vadd.f32 %v1549_v2, %v975_v3 }
 0x460   : > { %v979_v5 = vadd.f32 %v976_v4, %v1896_v1 }
 0x462   : > { %v982_v6 = vsel %vm758_vm1, %v979_v5, 0.0 }
 0x463   : > { %983 = vadd.xlane.f32.xlu2 %v982_v6 }
 0x465   : > { %v977_v7 = vpop.f32.mrf.mxu1 }
 0x4d6   : > { %v984_v8 = vpop.xlane.xlu2 %983 }
 0x4d7   : > { %v985_v10 = vmul.f32 %v984_v8, %v1900_v9 }
 0x4d9   : > { %v986_v11 = vsub.f32 %v979_v5, %v985_v10 }
 0x4db   : > { %v987_v12 = vmul.f32 %v986_v11, %v986_v11 }
 0x4dd   : > { %v988_v13 = vsel %vm758_vm1, %v987_v12, 0.0 }
 0x4de   : > { %989 = vadd.xlane.f32.xlu2 %v988_v13 }
 0x551   : > { %v990_v17 = vpop.xlane.xlu2 %989 }
 0x552   : > { %v991_v1 = vmul.f32 %v990_v17, %v1900_v9 }
 0x554   : > { %v992_v19 = vadd.f32 1e-05, %v991_v1 }
 0x556   : > { %1562 = vrsqrt.f32 %v992_v19  ;;  %vm999_vm9 = vweird.f32 %v992_v19 }
 0x55c   : > { %v1563_v20 = vpop.eup %1562 }
 0x55d   : > { %v994_v21 = vmul.f32 %v1563_v20, %v992_v19  ;;  %vm1000_vm8 = vweird.f32 %v1563_v20 }
 0x55e   : > { %vm1001_vm10 = vmor %vm999_vm9, %vm1000_vm8 }
 0x55f   : > { %v995_v22 = vmul.f32 %v1563_v20, %v994_v21 }
 0x561   : > { %v996_v23 = vmul.f32 0.5, %v995_v22 }
 0x563   : > { %v997_v24 = vsub.f32 1.5, %v996_v23 }
 0x565   : > { %v998_v25 = vmul.f32 %v1563_v20, %v997_v24 }
 0x567   : > { %v1002_v27 = vsel %vm1001_vm10, %v1563_v20, %v998_v25 }
 0x568   : > { %v1003_v28 = vmul.f32 %v1002_v27, %v986_v11 }
 0x56a   : > { %v1007_v30 = vmul.f32 %v1550_v26, %v1003_v28 }
 0x56c   : > { %v1011_v31 = vadd.f32 %v1551_v29, %v1007_v30 }
 0x56e   : > { %v1012_v32 = vpack.c.bf16 %v1011_v31, %v1011_v31 }
 0x570   : > { %1432 = vmatmul.msk.bf16.vlgmr.msrb.gmra.mxu2 %vm758_vm1, %v1012_v32 }
 0x5f3   : > { %v1045_v36 = vpop.f32.mrf.mxu2 }
 0x5f4   : > { %v1046_v37 = vadd.f32 %v1552_v35, %v1045_v36 }
 0x5f6   : > { %vm1049_vm11 = vcmp.gt.f32.partialorder %v1046_v37, 0.0  ;;  %v1050_v38 = vmul.f32 0.1, %v1046_v37 }
 0x5f8   : > { %v1051_v39 = vsel %vm1049_vm11, %v1046_v37, %v1050_v38 }
 0x5f9   : > { %v1052_v40 = vpack.c.bf16 %v1051_v39, %v1051_v39 }
 0x5fb   : > { %v1047_v41 = vpop.f32.mrf.mxu2  ;;  %1449 = vmatmul.msk.bf16.vlgmr.msrb.gmra.mxu3 %vm1089_vm12, %v1052_v40 }
 0x67e   : > { %v1102_v43 = vpop.f32.mrf.mxu3 }
 0x67f   : > { %v1103_v44 = vadd.f32 %v1553_v42, %v1102_v43 }
 0x681   : > { %v1106_v45 = vadd.f32 %v1103_v44, %v979_v5 }
 0x682   : > { %1111 = sbr.rel (%p1450_p1) target bundleno = 1940 (0x794), region = 92 }
 0x683   : > { %1107 = vst.msk [vmem:[%s1891_s24] sm:$0xff] %vm758_vm1, %v1106_v45 }
 0x686   : > { %v1104_v46 = vpop.f32.mrf.mxu3 }
 0x687   : > { %v1114_v47 = vsel %vm758_vm1, %v1106_v45, 0.0  ;;  %v1564_v62 = vld [vmem:[%s2104_s21] ss:$0 sm:$0xff] }
 0x688   : > { %1115 = vadd.xlane.f32.xlu0 %v1114_v47 }
 0x6fb   : > { %v1116_v48 = vpop.xlane.xlu0 %1115 }
 0x6fc   : > { %v1117_v49 = vmul.f32 %v1116_v48, %v1900_v9 }
 0x6fe   : > { %v1118_v50 = vsub.f32 %v1106_v45, %v1117_v49 }
 0x700   : > { %v1119_v51 = vmul.f32 %v1118_v50, %v1118_v50 }
 0x702   : > { %v1120_v52 = vsel %vm758_vm1, %v1119_v51, 0.0 }
 0x703   : > { %1121 = vadd.xlane.f32.xlu0 %v1120_v52 }
 0x776   : > { %v1122_v53 = vpop.xlane.xlu0 %1121 }
 0x777   : > { %v1123_v54 = vmul.f32 %v1122_v53, %v1900_v9  ;;  %v1565_v9 = vld [vmem:[%s2105_s27] ss:$0 sm:$0xff] }
 0x779   : > { %v1124_v55 = vadd.f32 1e-05, %v1123_v54 }
 0x77b   : > { %1566 = vrsqrt.f32 %v1124_v55  ;;  %vm1131_vm14 = vweird.f32 %v1124_v55 }
 0x781   : > { %v1567_v56 = vpop.eup %1566 }
 0x782   : > { %v1126_v57 = vmul.f32 %v1567_v56, %v1124_v55  ;;  %vm1132_vm13 = vweird.f32 %v1567_v56 }
 0x783   : > { %vm1133_vm15 = vmor %vm1131_vm14, %vm1132_vm13 }
 0x784   : > { %v1127_v58 = vmul.f32 %v1567_v56, %v1126_v57 }
 0x786   : > { %v1128_v59 = vmul.f32 0.5, %v1127_v58 }
 0x788   : > { %v1129_v60 = vsub.f32 1.5, %v1128_v59 }
 0x78a   : > { %v1130_v61 = vmul.f32 %v1567_v56, %v1129_v60 }
 0x78c   : > { %v1134_v63 = vsel %vm1133_vm15, %v1567_v56, %v1130_v61 }
 0x78d   : > { %v1135_v0 = vmul.f32 %v1134_v63, %v1118_v50 }
 0x78f   : > { %v1139_v2 = vmul.f32 %v1564_v62, %v1135_v0 }
 0x791   : > { %v1143_v3 = vadd.f32 %v1565_v9, %v1139_v2 }
 0x793   : > { %1144 = vst.msk [vmem:[%s1891_s24] sm:$0xff] %vm758_vm1, %v1143_v3 }
 0x794 PF: > { %s2106_s28 = sld [smem:[#allocation9_spill]]  ;;  %s1158_s14 = sshll.u32 %s1891_s24, 4  ;;  %s1159_s14 = int_to_ptr.vmem [resolvable:$true] %s1158_s14 }
 0x795   : > { %s2107_s22 = sld [smem:[#allocation6_spill]] }
 0x796   : > { %s2109_s2 = sld [smem:[#allocation28_spill]] }
 0x79a   : > { %s1452_s29 = sshll.u32 %s2106_s28, 3 }
 0x79b   : > { %s2110_s4 = sand.u32 1, %s2107_s22  }
 0x79c   : > { %s1156_s18 = scalar_lea.hbm %s2109_s2, %s1452_s29  ;;  %s1146_s3 = scalar_lea.sflag [#allocation3], %s2110_s4 }
 0x79d   : > { %s1160_s15 = sshll.u32 %s1156_s18, 4  ;;  %s1588_s30 = scalar_lea.hbm %s2109_s2, 16  ;;  %s1161_s15 = int_to_ptr.hbm [resolvable:$true] %s1160_s15 }
 0x79e   : > { %s1582_s23 = sshra.s32 %s1161_s15, 4  ;;  %s1583_s23 = int_to_ptr.hbm [resolvable:$true] %s1582_s23 }
 0x79f   : > { %s1584_s16 = scalar_lea.hbm %s1583_s23, 8  ;;  %p1589_p6 = scmp.lt.s32.totalorder %s1583_s23, %s2109_s2 }
 0x7a0   : > { %p1585_p2 = scmp.ne.s32.totalorder %s1583_s23, %s1584_s16  ;;  %p1590_p7 = scmp.lt.s32.totalorder %s1588_s30, %s1584_s16 }
 0x7a2   : > { %p1586_p4 = pnand %p1585_p2, %p1799_p3  ;;  %p1591_p8 = por %p1590_p7, %p1589_p6 }
 0x7a4   : > { %p1587_p5 = pneg %p1586_p4 }
 0x7a6   : > { %p1592_p10 = pnand %p1591_p8, %p1587_p5 }
 0x7a8   : > { %1595 = shalt.err (!%p1592_p10)
}
 0x7a9   : > { %1475 = dma.vmem_to_hbm [thread:$0]  (%p1799_p3), %s1159_s14, 128, %s1161_s15, %s1146_s3  }
 0x7aa PF: > { %s2111_s24 = sld [smem:[#allocation12_spill]] }
 0x7ab   : > { %s2112_s0 = sld [smem:[#allocation5_spill]] }
 0x7b0   : > { %p1481_p11 = scmp.ge.s32.totalorder %s2111_s24, 2 }
 0x7b1   : > { %s1172_s28 = sand.u32 1, %s2112_s0  }
 0x7b2   : > { %p1478_p12 = pnand %p1481_p11, %p1809_p9  ;;  %s1173_s22 = scalar_lea.sflag [#allocation3], %s1172_s28 }
 0x7b4   : > { %p1479_p13 = pneg %p1478_p12 }
 0x7b6   : > { %1629 = dma.done.wait (%p1479_p13), %s1173_s22, 128  }
 0x7b7   : > { %1631 = vsyncadd (%p1479_p13), %s1173_s22, 4294967168  ;;  %s29_s28 = sadd.s32 1, %s2111_s24   ;;  %s2114_s21 = sld [smem:[#allocation6_spill]] }
 0x7b8   : > { %p26_p0 = scmp.ge.s32.totalorder %s29_s28, 8   ;;  %s2115_s22 = sld [smem:[#allocation7_spill]] }
 0x7b9   : > { %s2116_s23 = sld [smem:[#allocation17_spill]] }
 0x7ba   : > { %s2117_s24 = sld [smem:[#allocation10_spill]]  ;;  %28 = sbr.rel (!%p26_p0) target bundleno = 14 (0xe), region = 166 }
 0x7bb   : > { %s2118_s25 = sld [smem:[#allocation11_spill]] }
 0x7bc   : > { %s2119_s26 = sld [smem:[#allocation13_spill]] }
 0x7bd   : > { %s2120_s27 = sld [smem:[#allocation15_spill]] }
 0x7bf   :  { %1179 = vsyncpa [#allocation3], 1 }
 0x7c0   :  { %1181 = vsyncpa [#allocation3 + $0x1], 1 }

</bundles_post_ra>
